<compile_context>
chip_gen: v7x
topology: tpu7x:2x2x1
jax: 0.10.0
libtpu: 0.0.40
codegen_flags: <defaults>
</compile_context>

<pallas_src>
import functools
import math

import jax
import jax.numpy as jnp
from jax import lax
from jax.experimental import pallas as pl
from jax.experimental.pallas import tpu as pltpu


def _flash_sdpa_kernel(q_ref, k_ref, v_ref, o_ref, qs_sc, m_sc, l_sc, acc_sc,
                       *, causal: bool, sm_scale: float):
    # Block shapes: q_ref / o_ref -> (g, tq, D); k_ref / v_ref -> (g, tk, D).
    g, tq, D = q_ref.shape
    tk = k_ref.shape[1]

    qi = pl.program_id(1)
    ki = pl.program_id(2)
    nk = pl.num_programs(2)

    # --- init: once per (bh-group, q-tile), on the first kv step -------------
    @pl.when(ki == 0)
    def _init():
        # Hoist the 1/sqrt(d_k) scale out of the kv loop: applied once per
        # q tile here instead of once per kv step, operands stay in the input
        # dtype (bf16 stays bf16) so the MXU sees native-precision inputs.
        qs_sc[...] = (q_ref[...] * sm_scale).astype(qs_sc.dtype)
        m_sc[...] = jnp.full(m_sc.shape, -jnp.inf, dtype=m_sc.dtype)
        l_sc[...] = jnp.zeros(l_sc.shape, dtype=l_sc.dtype)
        acc_sc[...] = jnp.zeros(acc_sc.shape, dtype=acc_sc.dtype)

    q_start = qi * tq
    k_start = ki * tk

    def _compute(apply_mask: bool):
        q = qs_sc[...]                                   # (g, tq, D), pre-scaled
        k = k_ref[...]                                   # (g, tk, D)

        # Batched Q @ K^T contracting D on both sides: K is read in its native
        # layout (no XLU transpose), f32 accumulation on the MXU.
        s = jnp.einsum("gqd,gkd->gqk", q, k,
                       preferred_element_type=jnp.float32)   # (g, tq, tk) f32

        if apply_mask:
            # Only diagonal-straddling tiles pay the iota/compare/select.
            row = q_start + lax.broadcasted_iota(jnp.int32, (1, tq, 1), 1)
            col = k_start + lax.broadcasted_iota(jnp.int32, (1, 1, tk), 2)
            s = jnp.where(row >= col, s, jnp.float32(-9.0e15))

        # Online softmax update (all stats in f32).
        # Safety of the -9.0e15 sentinel: the ki==0 tile is always visited and
        # every row has at least one unmasked column there (col 0), so m_sc is
        # finite before any fully-masked row/tile combination is reached and
        # exp(-9e15 - m) underflows to exactly 0.  Revisit if the tiling order
        # or mask type (e.g. sliding window) ever changes.
        m_prev = m_sc[...]                                        # (g, tq, 1)
        m_new = jnp.maximum(m_prev, jnp.max(s, axis=-1, keepdims=True))
        alpha = jnp.exp(m_prev - m_new)                           # rescale old
        p = jnp.exp(s - m_new)                                    # (g, tq, tk)
        l_sc[...] = alpha * l_sc[...] + jnp.sum(p, axis=-1, keepdims=True)
        pv = jnp.einsum("gqk,gkd->gqd", p.astype(v_ref.dtype), v_ref[...],
                        preferred_element_type=jnp.float32)       # (g, tq, D)
        acc_sc[...] = alpha * acc_sc[...] + pv
        m_sc[...] = m_new

    if causal:
        # Three regimes per (q-tile, kv-tile):
        #   * fully above the diagonal  -> skipped outright (and, thanks to the
        #     clamped kv index_map in the wrapper, never even DMA'd),
        #   * fully at/below the diagonal -> unmasked fast path,
        #   * straddling the diagonal     -> masked path.
        fully_visible = k_start + (tk - 1) <= q_start
        straddles = jnp.logical_and(k_start <= q_start + (tq - 1),
                                    jnp.logical_not(fully_visible))
        pl.when(fully_visible)(functools.partial(_compute, apply_mask=False))
        pl.when(straddles)(functools.partial(_compute, apply_mask=True))
    else:
        _compute(apply_mask=False)

    # --- finalize: normalize once, after all PV matmuls -----------------------
    @pl.when(ki == nk - 1)
    def _finalize():
        # One reciprocal per row + (g, tq, D) multiplies instead of tq*tk
        # divides.  approx=False keeps full f32 precision for the correctness
        # check; approx=True moves it onto the otherwise-idle EUP slot and is
        # the right choice for bf16 outputs.
        inv_l = pl.reciprocal(l_sc[...], approx=False)
        o_ref[...] = (acc_sc[...] * inv_l).astype(o_ref.dtype)


def _pick_tile(S, requested, cap=512):
    # Cap raised to 512: K/V HBM traffic scales with S/tq, and VMEM footprint
    # at tq=tk=512 is still only a few MiB (see vmem_limit_bytes below).
    if requested is not None:
        t = requested
    else:
        t = min(S, cap)
        while S % t != 0 and t > 8:
            t //= 2
        if S % t != 0:
            t = S
    assert S % t == 0, "sequence length must be divisible by the tile size"
    assert t == S or t % 8 == 0, "tile must be a multiple of 8 (TPU sublane)"
    return t


def scaled_dot_product(q, k, v, *, causal_mask: bool, tq=None, tk=None,
                       heads_per_block=None):
    """Pallas flash-attention implementation of ScaledDotProduct.forward."""
    B, H, S, D = q.shape
    assert k.shape == (B, H, S, D) and v.shape == (B, H, S, D)

    # Flatten (B, H) and pack g heads per program for D < 128: amortizes
    # per-grid-step overhead and DMA issue cost by g, and keeps MXU/VPU width
    # better utilized for shallow head dims.
    BH = B * H
    qf = q.reshape(BH, S, D)
    kf = k.reshape(BH, S, D)
    vf = v.reshape(BH, S, D)

    if heads_per_block is None:
        desired = max(1, 128 // D)
        g = 1
        for cand in range(min(desired, BH), 0, -1):
            if BH % cand == 0:
                g = cand
                break
    else:
        g = heads_per_block
        assert BH % g == 0, "heads_per_block must divide B*H"
    n_bh = BH // g

    tq = _pick_tile(S, tq)
    tk = _pick_tile(S, tk)
    nq = S // tq
    nk = S // tk
    sm_scale = 1.0 / math.sqrt(D)

    # Q and the output are resident across the kv axis (index_map ignores ki);
    # K/V stream along it.  Output writeback happens once per (bh-group, q-tile).
    q_spec = pl.BlockSpec((g, tq, D), lambda bh, qi, ki: (bh, qi, 0))
    o_spec = pl.BlockSpec((g, tq, D), lambda bh, qi, ki: (bh, qi, 0))

    if causal_mask:
        # Clamp the kv block index for steps that lie entirely above the
        # diagonal to the last block that intersects the causal region.  When
        # the block index repeats between consecutive grid steps Pallas skips
        # the DMA, so fully-masked kv tiles cost no K/V HBM traffic at all
        # (their compute is independently skipped inside the kernel).
        def kv_index(bh, qi, ki):
            lim = (qi * tq + (tq - 1)) // tk
            return (bh, jnp.minimum(ki, lim), 0)
    else:
        def kv_index(bh, qi, ki):
            return (bh, ki, 0)
    kv_spec = pl.BlockSpec((g, tk, D), kv_index)
    # TODO(synk): a fully lane-dense compute/output layout (heads interleaved
    # into a (tq, g*D) slab end-to-end) would also remove masked vst.msk stores
    # for D < 128; left as a follow-up since it needs a block-diagonal PV step.

    kernel = functools.partial(
        _flash_sdpa_kernel, causal=causal_mask, sm_scale=sm_scale)

    out = pl.pallas_call(
        kernel,
        out_shape=jax.ShapeDtypeStruct((BH, S, D), q.dtype),
        grid_spec=pltpu.PrefetchScalarGridSpec(
            num_scalar_prefetch=0,
            grid=(n_bh, nq, nk),
            in_specs=[q_spec, kv_spec, kv_spec],
            out_specs=o_spec,
            scratch_shapes=[
                pltpu.VMEM((g, tq, D), q.dtype),     # pre-scaled Q (per q-tile)
                pltpu.VMEM((g, tq, 1), jnp.float32),  # running max  m
                pltpu.VMEM((g, tq, 1), jnp.float32),  # running sum  l
                pltpu.VMEM((g, tq, D), jnp.float32),  # output accumulator
            ],
        ),
        compiler_params=pltpu.CompilerParams(
            dimension_semantics=("parallel", "parallel", "arbitrary"),
            # Headroom for tq=tk=512 with g packed heads (few MiB of blocks +
            # the compiler-materialized (g,tq,tk) f32 score/p tiles).  Well
            # under v5e/v6e's 128 MiB and v7x's 64 MiB physical VMEM.
            vmem_limit_bytes=48 * 1024 * 1024,
        ),
    )(qf, kf, vf)
    return out.reshape(B, H, S, D)


def _reference(q, k, v, *, causal_mask: bool):
    d_k = q.shape[-1]
    s = jnp.einsum("bhqd,bhkd->bhqk", q, k).astype(jnp.float32) / math.sqrt(d_k)
    if causal_mask:
        S = s.shape[-1]
        mask = jnp.tril(jnp.ones((S, S), dtype=jnp.float32))
        s = jnp.where(mask == 0, jnp.float32(-9.0e15), s)
    w = jax.nn.softmax(s, axis=-1)
    return jnp.einsum("bhqk,bhkd->bhqd", w, v.astype(jnp.float32)).astype(q.dtype)


def _check(q, k, v, *, causal, tq=None, tk=None):
    out = scaled_dot_product(q, k, v, causal_mask=causal, tq=tq, tk=tk)
    out = jax.block_until_ready(out)
    ref = _reference(q, k, v, causal_mask=causal)
    # Slightly relaxed vs pure f32 elementwise: online softmax reorders sums.
    assert jnp.allclose(out, ref, atol=1e-4, rtol=1e-4), (
        f"mismatch (causal={causal}): max err {jnp.max(jnp.abs(out - ref))}"
    )


if __name__ == "__main__":
    key = jax.random.PRNGKey(0)

    # Primary small shape consistent with the module (packs g=4 heads, D=32).
    B, H, S, D = 2, 4, 8, 32
    kq, kk, kv, k2q, k2k, k2v = jax.random.split(key, 6)
    q = jax.random.normal(kq, (B, H, S, D), dtype=jnp.float32)
    k = jax.random.normal(kk, (B, H, S, D), dtype=jnp.float32)
    v = jax.random.normal(kv, (B, H, S, D), dtype=jnp.float32)
    for causal in (False, True):
        _check(q, k, v, causal=causal)

    # Multi-tile shape: exercises online-softmax accumulation across kv tiles,
    # the causal fully-masked-tile skip + clamped kv index_map (DMA dedup),
    # the straddle-vs-fully-visible mask branching, and g=2 head packing.
    B2, H2, S2, D2 = 1, 2, 64, 32
    q2 = jax.random.normal(k2q, (B2, H2, S2, D2), dtype=jnp.float32)
    k2 = jax.random.normal(k2k, (B2, H2, S2, D2), dtype=jnp.float32)
    v2 = jax.random.normal(k2v, (B2, H2, S2, D2), dtype=jnp.float32)
    for causal in (False, True):
        _check(q2, k2, v2, causal=causal, tq=32, tk=32)

    print("KERNEL_OK")
</pallas_src>

<mosaic_0001>
module attributes {stable_mosaic.version = 11 : i64} {
  func.func @_flash_sdpa_kernel(%arg0: i32, %arg1: i32, %arg2: i32, %arg3: memref<4x8x32xf32, #tpu.memory_space<vmem>>, %arg4: memref<4x8x32xf32, #tpu.memory_space<vmem>>, %arg5: memref<4x8x32xf32, #tpu.memory_space<vmem>>, %arg6: memref<4x8x32xf32, #tpu.memory_space<vmem>>, %arg7: memref<4x8x32xf32, #tpu.memory_space<vmem>>, %arg8: memref<4x8x1xf32, #tpu.memory_space<vmem>>, %arg9: memref<4x8x1xf32, #tpu.memory_space<vmem>>, %arg10: memref<4x8x32xf32, #tpu.memory_space<vmem>>) attributes {dimension_semantics = [#tpu.dimension_semantics<parallel>, #tpu.dimension_semantics<parallel>, #tpu.dimension_semantics<arbitrary>], iteration_bounds = array<i64: 2, 1, 1>, scalar_prefetch = 0 : i64, scratch_operands = 4 : i64, tpu.core_type = #tpu.core_type<tc>, window_params = [{transform_indices = @transform_0, window_bounds = array<i64: 4, 8, 32>}, {transform_indices = @transform_1, window_bounds = array<i64: 4, 8, 32>}, {transform_indices = @transform_2, window_bounds = array<i64: 4, 8, 32>}, {transform_indices = @transform_3, window_bounds = array<i64: 4, 8, 32>}]} {
    %c0_i32 = arith.constant 0 : i32
    %0 = arith.cmpi eq, %arg2, %c0_i32 : i32
    %1 = arith.extui %0 : i1 to i32
    %c0_i32_0 = arith.constant 0 : i32
    %2 = arith.cmpi ne, %1, %c0_i32_0 : i32
    scf.if %2 {
      %c0_32 = arith.constant 0 : index
      %c0_33 = arith.constant 0 : index
      %c0_34 = arith.constant 0 : index
      %32 = vector.load %arg3[%c0_32, %c0_33, %c0_34] : memref<4x8x32xf32, #tpu.memory_space<vmem>>, vector<4x8x32xf32>
      %cst_35 = arith.constant 0.176776692 : f32
      %33 = vector.broadcast %cst_35 : f32 to vector<4x8x32xf32>
      %34 = arith.mulf %32, %33 : vector<4x8x32xf32>
      %c0_36 = arith.constant 0 : index
      %c0_37 = arith.constant 0 : index
      %c0_38 = arith.constant 0 : index
      %35 = vector.load %arg7[%c0_36, %c0_37, %c0_38] : memref<4x8x32xf32, #tpu.memory_space<vmem>>, vector<4x8x32xf32>
      tpu.vector_store %arg7[%c0_36, %c0_37, %c0_38], %34 {strides = array<i32>} : memref<4x8x32xf32, #tpu.memory_space<vmem>>, vector<4x8x32xf32>,
      %cst_39 = arith.constant 0xFF800000 : f32
      %36 = vector.broadcast %cst_39 : f32 to vector<4x8x1xf32>
      %c0_40 = arith.constant 0 : index
      %c0_41 = arith.constant 0 : index
      %c0_42 = arith.constant 0 : index
      %37 = vector.load %arg8[%c0_40, %c0_41, %c0_42] : memref<4x8x1xf32, #tpu.memory_space<vmem>>, vector<4x8x1xf32>
      tpu.vector_store %arg8[%c0_40, %c0_41, %c0_42], %36 {strides = array<i32>} : memref<4x8x1xf32, #tpu.memory_space<vmem>>, vector<4x8x1xf32>,
      %cst_43 = arith.constant 0.000000e+00 : f32
      %38 = vector.broadcast %cst_43 : f32 to vector<4x8x1xf32>
      %c0_44 = arith.constant 0 : index
      %c0_45 = arith.constant 0 : index
      %c0_46 = arith.constant 0 : index
      %39 = vector.load %arg9[%c0_44, %c0_45, %c0_46] : memref<4x8x1xf32, #tpu.memory_space<vmem>>, vector<4x8x1xf32>
      tpu.vector_store %arg9[%c0_44, %c0_45, %c0_46], %38 {strides = array<i32>} : memref<4x8x1xf32, #tpu.memory_space<vmem>>, vector<4x8x1xf32>,
      %cst_47 = arith.constant 0.000000e+00 : f32
      %40 = vector.broadcast %cst_47 : f32 to vector<4x8x32xf32>
      %c0_48 = arith.constant 0 : index
      %c0_49 = arith.constant 0 : index
      %c0_50 = arith.constant 0 : index
      %41 = vector.load %arg10[%c0_48, %c0_49, %c0_50] : memref<4x8x32xf32, #tpu.memory_space<vmem>>, vector<4x8x32xf32>
      tpu.vector_store %arg10[%c0_48, %c0_49, %c0_50], %40 {strides = array<i32>} : memref<4x8x32xf32, #tpu.memory_space<vmem>>, vector<4x8x32xf32>,
    } else {
    }
    %c0 = arith.constant 0 : index
    %c0_1 = arith.constant 0 : index
    %c0_2 = arith.constant 0 : index
    %3 = vector.load %arg7[%c0, %c0_1, %c0_2] : memref<4x8x32xf32, #tpu.memory_space<vmem>>, vector<4x8x32xf32>
    %c0_3 = arith.constant 0 : index
    %c0_4 = arith.constant 0 : index
    %c0_5 = arith.constant 0 : index
    %4 = vector.load %arg4[%c0_3, %c0_4, %c0_5] : memref<4x8x32xf32, #tpu.memory_space<vmem>>, vector<4x8x32xf32>
    "tpu.trace_start"() <{level = 10 : i32, message = "gqd,gkd->gqk"}> : () -> ()
    %cst = arith.constant dense<0.000000e+00> : vector<4x8x8xf32>
    %5 = tpu.matmul %3, %4, %cst {dimension_numbers = #tpu.dot_dimension_numbers<[2], [2], [1], [1], [0, 0, 0, 1, 1, 1], [0], [0]>} : vector<4x8x32xf32>, vector<4x8x32xf32>, vector<4x8x8xf32> -> vector<4x8x8xf32>
    "tpu.trace_stop"() : () -> ()
    %c0_6 = arith.constant 0 : index
    %c0_7 = arith.constant 0 : index
    %c0_8 = arith.constant 0 : index
    %6 = vector.load %arg8[%c0_6, %c0_7, %c0_8] : memref<4x8x1xf32, #tpu.memory_space<vmem>>, vector<4x8x1xf32>
    %cst_9 = arith.constant dense<0xFF800000> : vector<4x8xf32>
    %7 = vector.multi_reduction <maximumf>, %5, %cst_9 [2] : vector<4x8x8xf32> to vector<4x8xf32>
    %8 = vector.shape_cast %7 : vector<4x8xf32> to vector<4x8x1xf32>
    %9 = arith.maximumf %6, %8 : vector<4x8x1xf32>
    %10 = arith.subf %6, %9 : vector<4x8x1xf32>
    %11 = math.exp %10 : vector<4x8x1xf32>
    %12 = vector.broadcast %9 : vector<4x8x1xf32> to vector<4x8x8xf32>
    %13 = arith.subf %5, %12 : vector<4x8x8xf32>
    %14 = math.exp %13 : vector<4x8x8xf32>
    %c0_10 = arith.constant 0 : index
    %c0_11 = arith.constant 0 : index
    %c0_12 = arith.constant 0 : index
    %15 = vector.load %arg9[%c0_10, %c0_11, %c0_12] : memref<4x8x1xf32, #tpu.memory_space<vmem>>, vector<4x8x1xf32>
    %16 = arith.mulf %11, %15 : vector<4x8x1xf32>
    %cst_13 = arith.constant dense<0.000000e+00> : vector<4x8xf32>
    %17 = vector.multi_reduction <add>, %14, %cst_13 [2] : vector<4x8x8xf32> to vector<4x8xf32>
    %18 = vector.shape_cast %17 : vector<4x8xf32> to vector<4x8x1xf32>
    %19 = arith.addf %16, %18 : vector<4x8x1xf32>
    %c0_14 = arith.constant 0 : index
    %c0_15 = arith.constant 0 : index
    %c0_16 = arith.constant 0 : index
    %20 = vector.load %arg9[%c0_14, %c0_15, %c0_16] : memref<4x8x1xf32, #tpu.memory_space<vmem>>, vector<4x8x1xf32>
    tpu.vector_store %arg9[%c0_14, %c0_15, %c0_16], %19 {strides = array<i32>} : memref<4x8x1xf32, #tpu.memory_space<vmem>>, vector<4x8x1xf32>,
    %c0_17 = arith.constant 0 : index
    %c0_18 = arith.constant 0 : index
    %c0_19 = arith.constant 0 : index
    %21 = vector.load %arg5[%c0_17, %c0_18, %c0_19] : memref<4x8x32xf32, #tpu.memory_space<vmem>>, vector<4x8x32xf32>
    "tpu.trace_start"() <{level = 10 : i32, message = "gqk,gkd->gqd"}> : () -> ()
    %cst_20 = arith.constant dense<0.000000e+00> : vector<4x8x32xf32>
    %22 = tpu.matmul %14, %21, %cst_20 {dimension_numbers = #tpu.dot_dimension_numbers<[2], [1], [1], [2], [0, 0, 0, 1, 1, 2], [0], [0]>} : vector<4x8x8xf32>, vector<4x8x32xf32>, vector<4x8x32xf32> -> vector<4x8x32xf32>
    "tpu.trace_stop"() : () -> ()
    %c0_21 = arith.constant 0 : index
    %c0_22 = arith.constant 0 : index
    %c0_23 = arith.constant 0 : index
    %23 = vector.load %arg10[%c0_21, %c0_22, %c0_23] : memref<4x8x32xf32, #tpu.memory_space<vmem>>, vector<4x8x32xf32>
    %24 = vector.broadcast %11 : vector<4x8x1xf32> to vector<4x8x32xf32>
    %25 = arith.mulf %24, %23 : vector<4x8x32xf32>
    %26 = arith.addf %25, %22 : vector<4x8x32xf32>
    %c0_24 = arith.constant 0 : index
    %c0_25 = arith.constant 0 : index
    %c0_26 = arith.constant 0 : index
    %27 = vector.load %arg10[%c0_24, %c0_25, %c0_26] : memref<4x8x32xf32, #tpu.memory_space<vmem>>, vector<4x8x32xf32>
    tpu.vector_store %arg10[%c0_24, %c0_25, %c0_26], %26 {strides = array<i32>} : memref<4x8x32xf32, #tpu.memory_space<vmem>>, vector<4x8x32xf32>,
    %c0_27 = arith.constant 0 : index
    %c0_28 = arith.constant 0 : index
    %c0_29 = arith.constant 0 : index
    %28 = vector.load %arg8[%c0_27, %c0_28, %c0_29] : memref<4x8x1xf32, #tpu.memory_space<vmem>>, vector<4x8x1xf32>
    tpu.vector_store %arg8[%c0_27, %c0_28, %c0_29], %9 {strides = array<i32>} : memref<4x8x1xf32, #tpu.memory_space<vmem>>, vector<4x8x1xf32>,
    %c0_i32_30 = arith.constant 0 : i32
    %29 = arith.cmpi eq, %arg2, %c0_i32_30 : i32
    %30 = arith.extui %29 : i1 to i32
    %c0_i32_31 = arith.constant 0 : i32
    %31 = arith.cmpi ne, %30, %c0_i32_31 : i32
    scf.if %31 {
      %c0_32 = arith.constant 0 : index
      %c0_33 = arith.constant 0 : index
      %c0_34 = arith.constant 0 : index
      %32 = vector.load %arg9[%c0_32, %c0_33, %c0_34] : memref<4x8x1xf32, #tpu.memory_space<vmem>>, vector<4x8x1xf32>
      %33 = tpu.reciprocal %32 : vector<4x8x1xf32> -> vector<4x8x1xf32>
      %c0_35 = arith.constant 0 : index
      %c0_36 = arith.constant 0 : index
      %c0_37 = arith.constant 0 : index
      %34 = vector.load %arg10[%c0_35, %c0_36, %c0_37] : memref<4x8x32xf32, #tpu.memory_space<vmem>>, vector<4x8x32xf32>
      %35 = vector.broadcast %33 : vector<4x8x1xf32> to vector<4x8x32xf32>
      %36 = arith.mulf %34, %35 : vector<4x8x32xf32>
      %c0_38 = arith.constant 0 : index
      %c0_39 = arith.constant 0 : index
      %c0_40 = arith.constant 0 : index
      %37 = vector.load %arg6[%c0_38, %c0_39, %c0_40] : memref<4x8x32xf32, #tpu.memory_space<vmem>>, vector<4x8x32xf32>
      tpu.vector_store %arg6[%c0_38, %c0_39, %c0_40], %36 {strides = array<i32>} : memref<4x8x32xf32, #tpu.memory_space<vmem>>, vector<4x8x32xf32>,
    } else {
    }
    return
  }
  func.func @transform_0(%arg0: i32, %arg1: i32, %arg2: i32) -> (i32, i32, i32) {
    %c0_i32 = arith.constant 0 : i32
    %c0_i32_0 = arith.constant 0 : i32
    return %arg0, %arg1, %c0_i32 : i32, i32, i32
  }
  func.func @transform_1(%arg0: i32, %arg1: i32, %arg2: i32) -> (i32, i32, i32) {
    %c0_i32 = arith.constant 0 : i32
    %c0_i32_0 = arith.constant 0 : i32
    return %arg0, %arg2, %c0_i32 : i32, i32, i32
  }
  func.func @transform_2(%arg0: i32, %arg1: i32, %arg2: i32) -> (i32, i32, i32) {
    %c0_i32 = arith.constant 0 : i32
    %c0_i32_0 = arith.constant 0 : i32
    return %arg0, %arg2, %c0_i32 : i32, i32, i32
  }
  func.func @transform_3(%arg0: i32, %arg1: i32, %arg2: i32) -> (i32, i32, i32) {
    %c0_i32 = arith.constant 0 : i32
    %c0_i32_0 = arith.constant 0 : i32
    return %arg0, %arg1, %c0_i32 : i32, i32, i32
  }
}

</mosaic_0001>

<bundles_post_ra>
// kernel: tpu_custom_call.1
= control target key start
LH: loop header
LB: loop body
LE: loop exit
PB: predicated region body
PF: predicated region fallthrough
CT: control target
= control target key end

     0   :  { %s2081_s0 = inlined_call_operand.hbm [shape: f32[8,8,32], index: 0, kind: input, shape index: {}]   ;;  %s2082_s1 = inlined_call_operand.hbm [shape: f32[8,8,32], index: 1, kind: input, shape index: {}]   ;;  %s2083_s2 = inlined_call_operand.hbm [shape: f32[8,8,32], index: 2, kind: input, shape index: {}]   ;;  %s2084_s3 = inlined_call_operand.hbm [shape: f32[8,8,32], index: 3, kind: output, shape index: {}]  }
   0x1   :  { %2094 = sst [smem:[#allocation19_spill]] %s2082_s1 }
   0x2   :  { %8 = vsyncpa [#allocation7], 0 }
   0x3   :  { %10 = vsyncpa [#allocation7 + $0x1], 0 }
   0x4   :  { %11 = vsyncpa [#allocation10], 0 }
   0x5   :  { %13 = vsyncpa [#allocation10 + $0x1], 0 }
   0x6   :  { %14 = vsyncpa [#allocation8], 0 }
   0x7   :  { %16 = vsyncpa [#allocation8 + $0x1], 0  ;;  %s1677_s12 = smov 0   ;;  %s1679_s13 = smov 0  }
   0x8   :  { %s1681_s14 = smov 0   ;;  %s1683_s15 = smov 0  }
   0x9   :  { %s1685_s16 = smov 0   ;;  %s1687_s17 = smov 0  }
   0xa LB: > { %2095 = sst [smem:[#allocation16_spill]] %s1639_s16  ;;  %s1708_s18 = sadd.s32 4294967295, %s1643_s17   ;;  %s1643_s17 = sphi %s1687_s17, %s22_s17   ;;  %s1639_s16 = sphi %s1685_s16, %s2118_s16   ;;  %s1635_s15 = sphi %s1683_s15, %s2117_s15   ;;  %s1631_s14 = sphi %s1681_s14, %s2121_s14   ;;  %s1627_s13 = sphi %s1679_s13, %s2120_s13   ;;  %s1623_s12 = sphi %s1677_s12, %s2119_s12  }
   0xb   : > { %s1267_s19 = sadd.s32 4294967294, %s1643_s17   ;;  %s41_s20 = sadd.s32 1, %s1639_s16 }
   0xc   : > { %s50_s21 = sadd.s32 1, %s1631_s14  ;;  %p43_p0 = scmp.ge.s32.totalorder %s41_s20, 2 }
   0xd   : > { %p57_p1 = scmp.ne.s32.totalorder %s1631_s14, %s1627_s13  ;;  %p58_p2 = scmp.eq.s32.totalorder %s1643_s17, 0 }
   0xe   : > { %p63_p3 = scmp.ne.s32.totalorder %s1627_s13, %s1623_s12  ;;  %s2123_s20 = smov (%p43_p0, %s41_s20), 0 }
   0xf   : > { %2096 = sst [smem:[#allocation17_spill]] %s2123_s20  ;;  %p1720_p4 = por %p58_p2, %p57_p1 }
  0x10   : > { %p64_p5 = scmp.eq.s32.totalorder %s1708_s18, 0  ;;  %s45_s23 = ssub.s32 %s1639_s16, %s2123_s20 }
  0x11   : > { %p145_p6 = scmp.eq.s32.totalorder %s1708_s18, 1  ;;  %p48_p7 = scmp.eq.s32.totalorder %s45_s23, 0 }
  0x12   : > { %p1728_p8 = por %p64_p5, %p63_p3  ;;  %p151_p10 = scmp.eq.s32.totalorder %s1267_s19, 1 }
  0x13   : > { %p1732_p9 = por %p145_p6, %p57_p1  ;;  %p1383_p13 = scmp.lt.s32.totalorder %s1643_s17, 2 }
  0x14   : > { %s2098_s24 = scalar_select %p1728_p8, 1, 0 }
  0x15   : > { %s2099_s25 = scalar_select %p1732_p9, 1, 0 }
  0x16   : > { %s1737_s26 = scalar_select %p48_p7, %s1631_s14, %s50_s21  }
  0x17   : > { %p1739_p11 = por %p151_p10, %p63_p3  ;;  %s2087_s28 = sand.u32 1, %s1631_s14  }
  0x18   : > { %2100 = sst [smem:[#allocation18_spill]] %s1737_s26  ;;  %s1748_s29 = sshll.u32 %s2087_s28, 5 }
  0x19   : > { %s2101_s27 = scalar_select %p1739_p11, 1, 0 }
  0x1a   : > { %s1751_s30 = sshll.u32 %s1639_s16, 9  ;;  %p1755_p0 = pnand %p1383_p13, %p1720_p4 }
  0x1b   : > { %s193_s5 = sand.u32 1, %s1643_s17   ;;  %s2103_s1 = sld [smem:[#allocation19_spill]] }
  0x1c   : > { %s197_s9 = scalar_lea.vmem [#allocation9], %s1748_s29  ;;  %s1771_s11 = scalar_lea.sflag [#allocation10], %s193_s5 }
  0x1d   : > { %s205_s10 = sshll.u32 %s197_s9, 4  ;;  %p1777_p4 = pneg %p1755_p0  ;;  %s1768_s10 = int_to_ptr.vmem [resolvable:$true] %s205_s10 }
  0x21   : > { %s1764_s8 = scalar_lea.hbm %s2103_s1, %s1751_s30  ;;  %s1472_s6 = scalar_lea.hbm %s2103_s1, 1024 }
  0x22   : > { %s1467_s19 = scalar_lea.hbm %s1764_s8, 512  ;;  %p1473_p7 = scmp.lt.u32.totalorder %s1764_s8, %s2103_s1 }
  0x23   : > { %p1468_p3 = scmp.ne.s32.totalorder %s1764_s8, %s1467_s19  ;;  %p1474_p10 = scmp.lt.u32.totalorder %s1472_s6, %s1467_s19 }
  0x24   : > { %p1476_p12 = scmp.lt.u32.totalorder %s1467_s19, %s1764_s8 }
  0x25   : > { %p1470_p5 = pnand %p1777_p4, %p1468_p3  ;;  %p1475_p13 = por %p1474_p10, %p1473_p7 }
  0x27   : > { %p1471_p6 = pneg %p1470_p5  ;;  %p1477_p1 = por %p1476_p12, %p1475_p13 }
  0x29   : > { %p1478_p2 = pnand %p1477_p1, %p1471_p6 }
  0x2b   : > { %1481 = shalt.err (!%p1478_p2)
}
  0x2c   : > { %s1482_s5 = scalar_lea.vmem %s1768_s10, 512  ;;  %s1645_s22 = smov [#allocation9]  }
  0x2d   : > { %p1483_p3 = scmp.ne.s32.totalorder %s1768_s10, %s1482_s5  ;;  %s1487_s23 = sshll.u32 %s1645_s22, 4  ;;  %s1488_s23 = int_to_ptr.vmem [resolvable:$false] %s1487_s23 }
  0x2e   : > { %s1489_s7 = scalar_lea.vmem %s1488_s23, 1024  ;;  %p1490_p9 = scmp.lt.s32.totalorder %s1768_s10, %s1488_s23 }
  0x2f   : > { %p1485_p5 = pnand %p1483_p3, %p1777_p4  ;;  %p1491_p8 = scmp.lt.s32.totalorder %s1489_s7, %s1482_s5 }
  0x31   : > { %p1486_p11 = pneg %p1485_p5  ;;  %p1492_p7 = por %p1491_p8, %p1490_p9 }
  0x33   : > { %p1493_p10 = pnand %p1492_p7, %p1486_p11 }
  0x35   : > { %1496 = shalt.err (!%p1493_p10)
}
  0x36   : > { %s2088_s19 = smov 128   ;;  %s2090_s6 = smov 8  }
  0x37   : > { %1375 = dma.hbm_to_vmem [thread:$0]  (!%p1755_p0), %s1764_s8, 512, %s1768_s10, %s1771_s11, %s2088_s19, %s2088_s19, %s2090_s6  }
  0x38   : > { %p2105_p8 = scmp.lt.s32.totalorder %s1643_s17, 3  ;;  %p2106_p9 = scmp.ge.s32.totalorder %s1643_s17, 1 }
  0x39   : > { %s1816_s23 = scalar_lea.hbm %s2081_s0, %s1751_s30  ;;  %s175_s7 = scalar_lea.vmem [#allocation6], %s1748_s29 }
  0x3a   : > { %p1808_p11 = pnand %p2106_p9, %p2105_p8  ;;  %s183_s28 = sshll.u32 %s175_s7, 4  ;;  %s1819_s28 = int_to_ptr.vmem [resolvable:$true] %s183_s28 }
  0x3b   : > { %s1825_s19 = scalar_lea.hbm %s2083_s2, %s1751_s30  ;;  %s2108_s6 = sand.u32 1, %s1631_s14  }
  0x3c   : > { %s2107_s9 = scalar_select %p1808_p11, 1, 0 }
  0x3d   : > { %s1829_s1 = scalar_lea.sflag [#allocation7], %s2108_s6  ;;  %s1497_s20 = scalar_lea.hbm %s1816_s23, 512 }
  0x3e   : > { %p1498_p12 = scmp.ne.s32.totalorder %s1816_s23, %s1497_s20  ;;  %s1502_s16 = scalar_lea.hbm %s2081_s0, 1024 }
  0x3f   : > { %p1503_p6 = scmp.lt.u32.totalorder %s1816_s23, %s2081_s0  ;;  %p1504_p13 = scmp.lt.u32.totalorder %s1502_s16, %s1497_s20 }
  0x40   : > { %p1500_p1 = pnand %p1498_p12, %p1777_p4  ;;  %p1506_p5 = scmp.lt.u32.totalorder %s1497_s20, %s1816_s23 }
  0x41   : > { %p1505_p3 = por %p1504_p13, %p1503_p6 }
  0x42   : > { %p1501_p2 = pneg %p1500_p1 }
  0x43   : > { %p1507_p7 = por %p1506_p5, %p1505_p3 }
  0x45   : > { %p1508_p10 = pnand %p1507_p7, %p1501_p2 }
  0x47   : > { %1511 = shalt.err (!%p1508_p10)
}
  0x48   : > { %s1512_s30 = scalar_lea.vmem %s1819_s28, 512  ;;  %s1648_s6 = smov [#allocation6]  }
  0x49   : > { %p1513_p8 = scmp.ne.s32.totalorder %s1819_s28, %s1512_s30  ;;  %s1517_s8 = sshll.u32 %s1648_s6, 4  ;;  %s1518_s8 = int_to_ptr.vmem [resolvable:$false] %s1517_s8 }
  0x4a   : > { %s1519_s26 = scalar_lea.vmem %s1518_s8, 1024  ;;  %p1520_p1 = scmp.lt.s32.totalorder %s1819_s28, %s1518_s8 }
  0x4b   : > { %p1515_p9 = pnand %p1513_p8, %p1777_p4  ;;  %p1521_p11 = scmp.lt.s32.totalorder %s1519_s26, %s1512_s30 }
  0x4d   : > { %p1516_p12 = pneg %p1515_p9  ;;  %p1522_p6 = por %p1521_p11, %p1520_p1 }
  0x4f   : > { %p1523_p13 = pnand %p1522_p6, %p1516_p12 }
  0x51   : > { %1526 = shalt.err (!%p1523_p13)
}
  0x52   : > { %s2109_s16 = smov 8   ;;  %s2110_s20 = smov 128  }
  0x53   : > { %1372 = dma.hbm_to_vmem [thread:$0]  (!%p1755_p0), %s1816_s23, 512, %s1819_s28, %s1829_s1, %s2110_s20, %s2110_s20, %s2109_s16  }
  0x54   : > { %s219_s10 = scalar_lea.vmem [#allocation11], %s1748_s29  ;;  %s1527_s22 = scalar_lea.hbm %s1825_s19, 512 }
  0x55   : > { %s227_s5 = sshll.u32 %s219_s10, 4  ;;  %p1528_p11 = scmp.ne.s32.totalorder %s1825_s19, %s1527_s22  ;;  %s1857_s5 = int_to_ptr.vmem [resolvable:$true] %s227_s5 }
  0x56   : > { %s1532_s6 = scalar_lea.hbm %s2083_s2, 1024  ;;  %p1533_p5 = scmp.lt.u32.totalorder %s1825_s19, %s2083_s2 }
  0x57   : > { %p1530_p2 = pnand %p1528_p11, %p1777_p4  ;;  %p1534_p7 = scmp.lt.u32.totalorder %s1532_s6, %s1527_s22 }
  0x58   : > { %p1536_p8 = scmp.lt.u32.totalorder %s1527_s22, %s1825_s19 }
  0x59   : > { %p1531_p3 = pneg %p1530_p2  ;;  %p1535_p10 = por %p1534_p7, %p1533_p5 }
  0x5b   : > { %p1537_p9 = por %p1536_p8, %p1535_p10 }
  0x5d   : > { %p1538_p12 = pnand %p1537_p9, %p1531_p3 }
  0x5f   : > { %1541 = shalt.err (!%p1538_p12)
}
  0x60   : > { %s1542_s1 = scalar_lea.vmem %s1857_s5, 512  ;;  %s1649_s28 = smov [#allocation11]  }
  0x61   : > { %p1543_p1 = scmp.ne.s32.totalorder %s1857_s5, %s1542_s1  ;;  %s1547_s29 = sshll.u32 %s1649_s28, 4  ;;  %s1548_s29 = int_to_ptr.vmem [resolvable:$false] %s1547_s29 }
  0x62   : > { %s1549_s23 = scalar_lea.vmem %s1548_s29, 1024  ;;  %p1550_p11 = scmp.lt.s32.totalorder %s1857_s5, %s1548_s29 }
  0x63   : > { %p1545_p6 = pnand %p1543_p1, %p1777_p4  ;;  %p1551_p2 = scmp.lt.s32.totalorder %s1549_s23, %s1542_s1 }
  0x65   : > { %p1546_p13 = pneg %p1545_p6  ;;  %p1552_p5 = por %p1551_p2, %p1550_p11 }
  0x67   : > { %p1553_p7 = pnand %p1552_p5, %p1546_p13 }
  0x69   : > { %1556 = shalt.err (!%p1553_p7)
}
  0x6a   : > { %1378 = dma.hbm_to_vmem [thread:$0]  (!%p1755_p0), %s1825_s19, 512, %s1857_s5, %s1771_s11, %s2110_s20, %s2110_s20, %s2109_s16  }
  0x6b   : > { %p2111_p4 = scmp.ne.s32.totalorder %s2107_s9, 0 }
  0x6c   : > { %s1887_s21 = sand.u32 (!%p2111_p4), 1, %s1627_s13   ;;  %p2112_p3 = scmp.ne.s32.totalorder (!%p2111_p4), %s2098_s24, 0 }
  0x6d   : > { %239 = sbr.rel (%p2111_p4) target bundleno = 953 (0x3b9), region = 32  ;;  %s1890_s10 = sshll.u32 (!%p2111_p4), %s1887_s21, 5 }
  0x6e   : > { %s242_s4 = scalar_lea.sflag (!%p2111_p4), [#allocation7], %s1887_s21  ;;  %s1894_s22 = scalar_lea.vmem (!%p2111_p4), [#allocation6], %s1890_s10 }
  0x74   : > { %1610 = dma.done.wait (%p2112_p3), %s242_s4, 512  }
  0x75   : > { %1612 = vsyncadd (%p2112_p3), %s242_s4, 4294966784  ;;  %s250_s11 = sand.u32 1, %s1708_s18   ;;  %s1902_s9 = scalar_lea.vmem [#allocation9], %s1890_s10 }
  0x76   : > { %s251_s19 = scalar_lea.sflag [#allocation10], %s250_s11 }
  0x77   : > { %1614 = dma.done.wait (%p2112_p3), %s251_s19, 1024  }
  0x78   : > { %1616 = vsyncadd (%p2112_p3), %s251_s19, 4294966272  ;;  %vm312_vm0 = vcmask 261120   ;;  %v1650_v0 = vmov 0.0   ;;  %vm1651_vm1 = vmmov 0   ;;  %v334_v1 = vld [vmem:[%s1902_s9] sm:$0xff]  ;;  %v335_v3 = vld [vmem:[%s1902_s9 + $0x8] sm:$0xff] }
  0x79   : > { %1321 = vmatprep.subr.mxu0 %v1650_v0  ;;  %326 = vst.msk [vmem:[#allocation5] sm:$0xff] %vm312_vm0, %v1650_v0  ;;  %327 = vst.msk [vmem:[#allocation5 + $0x8] sm:$0xff] %vm312_vm0, %v1650_v0  ;;  %1323 = vmatprep.mubr.msk.f32.mxu0 %vm1651_vm1, %v1650_v0  ;;  %v304_v2 = vld [vmem:[%s1894_s22] sm:$0xff]  ;;  %v305_v5 = vld [vmem:[%s1894_s22 + $0x8] sm:$0xff]  ;;  %vm317_vm2 = vcmask 7168   ;;  %v1652_v17 = vmov -inf  }
  0x7a   : > { %328 = vst.msk [vmem:[#allocation5 + $0x10] sm:$0xff] %vm312_vm0, %v1650_v0  ;;  %329 = vst.msk [vmem:[#allocation5 + $0x18] sm:$0xff] %vm312_vm0, %v1650_v0  ;;  %1326 = vmatprep.subr.mxu1 %v1650_v0  ;;  %1328 = vmatprep.mubr.msk.f32.mxu1 %vm1651_vm1, %v1650_v0  ;;  %v308_v4 = vmul.f32 0.17677669, %v304_v2  ;;  %v306_v6 = vld [vmem:[%s1894_s22 + $0x10] sm:$0xff]  ;;  %v307_v9 = vld [vmem:[%s1894_s22 + $0x18] sm:$0xff] }
  0x7b   : > { %1322 = vmatpush3.xpose.msk.msra.mxu0 %vm312_vm0, %v334_v1  ;;  %1327 = vmatpush3.xpose.msk.msra.mxu1 %vm312_vm0, %v335_v3  ;;  %v309_v7 = vmul.f32 0.17677669, %v305_v5  ;;  %v310_v8 = vmul.f32 0.17677669, %v306_v6  ;;  %v311_v10 = vmul.f32 0.17677669, %v307_v9 }
  0x7c   : > { %1331 = vmatprep.subr.mxu0 %v1650_v0  ;;  %1336 = vmatprep.subr.mxu1 %v1650_v0  ;;  %313 = vst.msk [vmem:[#allocation2] sm:$0xff] %vm312_vm0, %v308_v4  ;;  %v336_v11 = vld [vmem:[%s1902_s9 + $0x10] sm:$0xff]  ;;  %v337_v13 = vld [vmem:[%s1902_s9 + $0x18] sm:$0xff]  ;;  %vm647_vm3 = vcmask 64512   ;;  %v1653_v30 = vmov 0   ;;  %s263_s18 = scalar_lea.vmem [#allocation11], %s1890_s10 }
  0x7d   : > { %314 = vst.msk [vmem:[#allocation2 + $0x8] sm:$0xff] %vm312_vm0, %v309_v7  ;;  %315 = vst.msk [vmem:[#allocation2 + $0x10] sm:$0xff] %vm312_vm0, %v310_v8  ;;  %1441 = vset.pattern.permute.xlu0 %v1653_v30  ;;  %1442 = vset.pattern.permute.xlu1 %v1653_v30  ;;  %v737_v47 = vld [vmem:[%s263_s18] sm:$0xff]  ;;  %v738_v48 = vld [vmem:[%s263_s18 + $0x8] sm:$0xff]  ;;  %s295_s24 = scalar_lea.vmem [#allocation12], %s1890_s10  ;;  %s1304_s20 = sshll.u32 %s1635_s15, 9 }
  0x7e   : > { %316 = vst.msk [vmem:[#allocation2 + $0x18] sm:$0xff] %vm312_vm0, %v311_v10  ;;  %v739_v60 = vld [vmem:[%s263_s18 + $0x10] sm:$0xff]  ;;  %v740_v1 = vld [vmem:[%s263_s18 + $0x18] sm:$0xff]  ;;  %s1131_s16 = sshll.u32 %s295_s24, 4  ;;  %s2031_s30 = scalar_lea.hbm %s2084_s3, %s1304_s20  ;;  %s2025_s16 = int_to_ptr.vmem [resolvable:$true] %s1131_s16 }
  0x7f   : > { %318 = vst.msk [vmem:[#allocation3] sm:$0xff] %vm317_vm2, %v1652_v17  ;;  %319 = vst.msk [vmem:[#allocation3 + $0x8] sm:$0xff] %vm317_vm2, %v1652_v17  ;;  %s1117_s6 = scalar_lea.sflag [#allocation8], %s1887_s21  ;;  %s1557_s8 = scalar_lea.vmem %s2025_s16, 512 }
  0x80   : > { %320 = vst.msk [vmem:[#allocation3 + $0x10] sm:$0xff] %vm317_vm2, %v1652_v17  ;;  %321 = vst.msk [vmem:[#allocation3 + $0x18] sm:$0xff] %vm317_vm2, %v1652_v17  ;;  %p1558_p0 = scmp.ne.s32.totalorder %s2025_s16, %s1557_s8  ;;  %p2113_p10 = scmp.ne.s32.totalorder %s2099_s25, 0 }
  0x81   : > { %322 = vst.msk [vmem:[#allocation4] sm:$0xff] %vm317_vm2, %v1650_v0  ;;  %323 = vst.msk [vmem:[#allocation4 + $0x8] sm:$0xff] %vm317_vm2, %v1650_v0  ;;  %s1654_s15 = smov [#allocation12]  }
  0x82   : > { %324 = vst.msk [vmem:[#allocation4 + $0x10] sm:$0xff] %vm317_vm2, %v1650_v0  ;;  %325 = vst.msk [vmem:[#allocation4 + $0x18] sm:$0xff] %vm317_vm2, %v1650_v0  ;;  %p1559_p8 = pnand %p1558_p0, %p2113_p10  ;;  %s1561_s26 = sshll.u32 %s1654_s15, 4  ;;  %s1562_s26 = int_to_ptr.vmem [resolvable:$false] %s1561_s26 }
  0x83   : > { %v330_v12 = vld [vmem:[#allocation2] sm:$0xff]  ;;  %s1563_s1 = scalar_lea.vmem %s1562_s26, 1024  ;;  %p1564_p12 = scmp.lt.s32.totalorder %s2025_s16, %s1562_s26 }
  0x84   : > { %1324 = vmatmul.mubr.msk.f32.vlgmr.msra.gmra.mrb[0].mxu0 %vm312_vm0, %v330_v12  ;;  %v331_v14 = vld [vmem:[#allocation2 + $0x8] sm:$0xff]  ;;  %v332_v15 = vld [vmem:[#allocation2 + $0x10] sm:$0xff]  ;;  %p1560_p9 = pneg %p1559_p8  ;;  %p1565_p1 = scmp.lt.s32.totalorder %s1563_s1, %s1557_s8 }
  0x85   : > { %1329 = vmatmul.mubr.msk.f32.vlgmr.msra.gmra.mrb[0].mxu1 %vm312_vm0, %v331_v14  ;;  %1332 = vmatpush3.xpose.msk.msra.mxu0 %vm312_vm0, %v336_v11  ;;  %v333_v16 = vld [vmem:[#allocation2 + $0x18] sm:$0xff] }
  0x86   : > { %1333 = vmatprep.mubr.msk.f32.mxu0 %vm1651_vm1, %v1650_v0  ;;  %1337 = vmatpush3.xpose.msk.msra.mxu1 %vm312_vm0, %v337_v13  ;;  %v1970_v31 = vld [vmem:[#allocation3] sm:$0xff]  ;;  %v1975_v34 = vld [vmem:[#allocation3 + $0x8] sm:$0xff]  ;;  %p1566_p6 = por %p1565_p1, %p1564_p12 }
  0x87   : > { %1338 = vmatprep.mubr.msk.f32.mxu1 %vm1651_vm1, %v1650_v0  ;;  %1341 = vmatprep.subr.mxu0 %v1650_v0  ;;  %v1977_v35 = vld [vmem:[#allocation3 + $0x10] sm:$0xff]  ;;  %v1986_v41 = vld [vmem:[#allocation3 + $0x18] sm:$0xff] }
  0x88   : > { %1334 = vmatmul.mubr.msk.f32.vlgmr.msra.gmra.mrb[2].mxu0 %vm312_vm0, %v332_v15  ;;  %1346 = vmatprep.subr.mxu1 %v1650_v0  ;;  %v708_v15 = vld [vmem:[#allocation4] sm:$0xff]  ;;  %p1567_p13 = pnand %p1566_p6, %p1560_p9 }
  0x89   : > { %1339 = vmatmul.mubr.msk.f32.vlgmr.msra.gmra.mrb[2].mxu1 %vm312_vm0, %v333_v16  ;;  %1343 = vmatprep.mubr.msk.f32.mxu0 %vm1651_vm1, %v1650_v0 }
  0x8a   : > { %1348 = vmatprep.mubr.msk.f32.mxu1 %vm1651_vm1, %v1650_v0  ;;  %1342 = vmatpush3.msra.mxu0 %v737_v47 }
  0x8b   : > { %1351 = vmatprep.subr.mxu0 %v1650_v0  ;;  %1347 = vmatpush3.msra.mxu1 %v738_v48 }
  0x8c   : > { %1356 = vmatprep.subr.mxu1 %v1650_v0 }
 0x157   : > { %v411_v18 = vpop.f32.mrb[0].mxu0 }
 0x158   : > { %v1325_v19 = vpop.f32.mrb[1].mxu0  ;;  %v648_v20 = vsel %vm647_vm3, %v411_v18, -inf  ;;  %v487_v21 = vpop.f32.mrb[0].mxu1 }
 0x159   : > { %649 = vmax.xlane.f32.xlu0 %v648_v20  ;;  %v1330_v22 = vpop.f32.mrb[1].mxu1  ;;  %v651_v23 = vsel %vm647_vm3, %v487_v21, -inf }
 0x15a   : > { %v710_v22 = vld [vmem:[#allocation4 + $0x10] sm:$0xff] }
 0x15b   : > { %v563_v24 = vpop.f32.mrb[2].mxu0 }
 0x15c   : > { %v1335_v25 = vpop.f32.mrb[3].mxu0  ;;  %v654_v26 = vsel %vm647_vm3, %v563_v24, -inf  ;;  %v639_v27 = vpop.f32.mrb[2].mxu1 }
 0x15d   : > { %652 = vmax.xlane.f32.xlu0 %v651_v23  ;;  %655 = vmax.xlane.f32.xlu1 %v654_v26  ;;  %v1340_v28 = vpop.f32.mrb[3].mxu1  ;;  %v657_v29 = vsel %vm647_vm3, %v639_v27, -inf  ;;  %v711_v26 = vld [vmem:[#allocation4 + $0x18] sm:$0xff] }
 0x161   : > { %658 = vmax.xlane.f32.xlu1 %v657_v29 }
 0x1e6   : > { %v650_v32 = vpop.xlane.xlu0 %649 }
 0x1e7   : > { %v1973_v33 = vmax.f32 %v1970_v31, %v650_v32 }
 0x1e9   : > { %v664_v36 = vsub.f32 %v1970_v31, %v1973_v33  ;;  %1069 = vst.msk [vmem:[#allocation3] sm:$0xff] %vm317_vm2, %v1973_v33  ;;  %678 = vperm.xlu0 %1441, %v1973_v33  }
 0x1ea   : > { %v653_v37 = vpop.xlane.xlu0 %652  ;;  %v656_v38 = vpop.xlane.xlu1 %655 }
 0x1eb   : > { %v661_v39 = vmax.f32 %v1975_v34, %v653_v37  ;;  %v662_v40 = vmax.f32 %v1977_v35, %v656_v38  ;;  %v668_v9 = vmul.f32 1.442695, %v664_v36 }
 0x1ed   : > { %v665_v42 = vsub.f32 %v1975_v34, %v661_v39  ;;  %1070 = vst.msk [vmem:[#allocation3 + $0x8] sm:$0xff] %vm317_vm2, %v661_v39  ;;  %683 = vperm.xlu1 %1442, %v661_v39   ;;  %v666_v43 = vsub.f32 %v1977_v35, %v662_v40  ;;  %1071 = vst.msk [vmem:[#allocation3 + $0x10] sm:$0xff] %vm317_vm2, %v662_v40  ;;  %v1033_v39 = vld [vmem:[#allocation5] sm:$0xff] }
 0x1ee   : > { %v659_v44 = vpop.xlane.xlu1 %658 }
 0x1ef   : > { %v663_v45 = vmax.f32 %v1986_v41, %v659_v44  ;;  %v670_v7 = vmul.f32 1.442695, %v665_v42  ;;  %v1034_v42 = vld [vmem:[#allocation5 + $0x8] sm:$0xff] }
 0x1f1   : > { %688 = vperm.xlu1 %1442, %v662_v40   ;;  %v667_v46 = vsub.f32 %v1986_v41, %v663_v45  ;;  %1072 = vst.msk [vmem:[#allocation3 + $0x18] sm:$0xff] %vm317_vm2, %v663_v45 }
 0x1f3   : > { %v674_v10 = vmul.f32 1.442695, %v667_v46 }
 0x1f5   : > { %693 = vperm.xlu1 %1442, %v663_v45  }
 0x268   : > { %v679_v49 = vpop.permute.xlu0 %678 }
 0x269   : > { %v696_v50 = vsub.f32 %v411_v18, %v679_v49  ;;  %v709_v18 = vld [vmem:[#allocation4 + $0x8] sm:$0xff]  ;;  %v1035_v49 = vld [vmem:[#allocation5 + $0x10] sm:$0xff] }
 0x26b   : > { %v700_v51 = vmul.f32 1.442695, %v696_v50 }
 0x26c   : > { %v684_v52 = vpop.permute.xlu1 %683 }
 0x26d   : > { %1443 = vpow2.f32 %v700_v51  ;;  %v697_v53 = vsub.f32 %v487_v21, %v684_v52 }
 0x26f   : > { %v702_v54 = vmul.f32 1.442695, %v697_v53 }
 0x270   : > { %v689_v55 = vpop.permute.xlu1 %688 }
 0x271   : > { %1445 = vpow2.f32 %v702_v54  ;;  %v698_v56 = vsub.f32 %v563_v24, %v689_v55  ;;  %v1036_v54 = vld [vmem:[#allocation5 + $0x18] sm:$0xff] }
 0x273   : > { %v704_v57 = vmul.f32 1.442695, %v698_v56 }
 0x274   : > { %v694_v58 = vpop.permute.xlu1 %693 }
 0x275   : > { %1447 = vpow2.f32 %v704_v57  ;;  %v699_v59 = vsub.f32 %v639_v27, %v694_v58 }
 0x277   : > { %v1444_v61 = vpop.eup %1443  ;;  %v706_v62 = vmul.f32 1.442695, %v699_v59 }
 0x278   : > { %1344 = vmatmul.mubr.msk.f32.vlgmr.msra.gmra.mrb[4].mxu0 %vm647_vm3, %v1444_v61  ;;  %v716_v63 = vsel %vm647_vm3, %v1444_v61, 0.0 }
 0x279   : > { %1449 = vpow2.f32 %v706_v62  ;;  %717 = vadd.xlane.f32.xlu1 %v716_v63  ;;  %1352 = vmatpush3.msra.mxu0 %v739_v60 }
 0x27a   : > { %1353 = vmatprep.mubr.msk.f32.mxu0 %vm1651_vm1, %v1650_v0  ;;  %1451 = vpow2.f32 %v670_v7 }
 0x27b   : > { %v1446_v2 = vpop.eup %1445  ;;  %1453 = vpow2.f32 %v668_v9 }
 0x27c   : > { %1349 = vmatmul.mubr.msk.f32.vlgmr.msra.gmra.mrb[4].mxu1 %vm647_vm3, %v1446_v2  ;;  %v719_v3 = vsel %vm647_vm3, %v1446_v2, 0.0 }
 0x27d   : > { %720 = vadd.xlane.f32.xlu0 %v719_v3  ;;  %1357 = vmatpush3.msra.mxu1 %v740_v1 }
 0x27e   : > { %1358 = vmatprep.mubr.msk.f32.mxu1 %vm1651_vm1, %v1650_v0  ;;  %v672_v0 = vmul.f32 1.442695, %v666_v43 }
 0x27f   : > { %v1448_v4 = vpop.eup %1447 }
 0x280   : > { %1354 = vmatmul.mubr.msk.f32.vlgmr.msra.gmra.mrb[6].mxu0 %vm647_vm3, %v1448_v4  ;;  %v722_v5 = vsel %vm647_vm3, %v1448_v4, 0.0  ;;  %1455 = vpow2.f32 %v672_v0 }
 0x281   : > { %723 = vadd.xlane.f32.xlu1 %v722_v5  ;;  %1457 = vpow2.f32 %v674_v10 }
 0x283   : > { %v1450_v6 = vpop.eup %1449 }
 0x284   : > { %1359 = vmatmul.mubr.msk.f32.vlgmr.msra.gmra.mrb[6].mxu1 %vm647_vm3, %v1450_v6  ;;  %v725_v8 = vsel %vm647_vm3, %v1450_v6, 0.0  ;;  %v1452_v11 = vpop.eup %1451 }
 0x285   : > { %726 = vadd.xlane.f32.xlu1 %v725_v8  ;;  %v1454_v12 = vpop.eup %1453  ;;  %v713_v20 = vmul.f32 %v1452_v11, %v709_v18 }
 0x286   : > { %v712_v16 = vmul.f32 %v1454_v12, %v708_v15 }
 0x28a   : > { %v1456_v13 = vpop.eup %1455 }
 0x28b   : > { %v1458_v14 = vpop.eup %1457  ;;  %v714_v24 = vmul.f32 %v1456_v13, %v710_v22 }
 0x28c   : > { %v715_v29 = vmul.f32 %v1458_v14, %v711_v26 }
 0x293   : > { %1044 = vperm.xlu0 %1441, %v1452_v11  }
 0x296   : > { %1039 = vperm.xlu1 %1442, %v1454_v12  }
 0x29a   : > { %1049 = vperm.xlu1 %1442, %v1456_v13  }
 0x29e   : > { %1054 = vperm.xlu1 %1442, %v1458_v14  }
 0x306   : > { %v718_v17 = vpop.xlane.xlu1 %717 }
 0x307   : > { %v728_v19 = vadd.f32 %v718_v17, %v712_v16 }
 0x309   : > { %733 = vst.msk [vmem:[#allocation4] sm:$0xff] %vm317_vm2, %v728_v19 }
 0x30a   : > { %v721_v21 = vpop.xlane.xlu0 %720 }
 0x30b   : > { %v729_v23 = vadd.f32 %v721_v21, %v713_v20 }
 0x30d   : > { %734 = vst.msk [vmem:[#allocation4 + $0x8] sm:$0xff] %vm317_vm2, %v729_v23 }
 0x30e   : > { %v724_v25 = vpop.xlane.xlu1 %723 }
 0x30f   : > { %v730_v27 = vadd.f32 %v724_v25, %v714_v24 }
 0x310   : > { %v1076_v28 = vld [vmem:[#allocation4] sm:$0xff] }
 0x311   : > { %735 = vst.msk [vmem:[#allocation4 + $0x10] sm:$0xff] %vm317_vm2, %v730_v27  ;;  %1459 = vrcp.f32 %v1076_v28 }
 0x312   : > { %v727_v30 = vpop.xlane.xlu1 %726  ;;  %v1045_v43 = vpop.permute.xlu0 %1044 }
 0x313   : > { %v731_v31 = vadd.f32 %v727_v30, %v715_v29  ;;  %v1058_v48 = vmul.f32 %v1045_v43, %v1034_v42 }
 0x314   : > { %v1077_v32 = vld [vmem:[#allocation4 + $0x8] sm:$0xff] }
 0x315   : > { %736 = vst.msk [vmem:[#allocation4 + $0x18] sm:$0xff] %vm317_vm2, %v731_v31  ;;  %1461 = vrcp.f32 %v1077_v32 }
 0x316   : > { %v1040_v40 = vpop.permute.xlu1 %1039 }
 0x317   : > { %v1057_v41 = vmul.f32 %v1040_v40, %v1033_v39 }
 0x318   : > { %v1078_v33 = vld [vmem:[#allocation4 + $0x10] sm:$0xff] }
 0x319   : > { %1463 = vrcp.f32 %v1078_v33 }
 0x31a   : > { %v1050_v47 = vpop.permute.xlu1 %1049 }
 0x31b   : > { %v1460_v34 = vpop.eup %1459  ;;  %v1059_v53 = vmul.f32 %v1050_v47, %v1035_v49 }
 0x31c   : > { %1090 = vperm.xlu1 %1442, %v1460_v34   ;;  %v1079_v35 = vld [vmem:[#allocation4 + $0x18] sm:$0xff] }
 0x31d   : > { %1465 = vrcp.f32 %v1079_v35 }
 0x31e   : > { %v1055_v55 = vpop.permute.xlu1 %1054 }
 0x31f   : > { %v1462_v36 = vpop.eup %1461  ;;  %v1060_v59 = vmul.f32 %v1055_v55, %v1036_v54 }
 0x320   : > { %1095 = vperm.xlu0 %1441, %v1462_v36  }
 0x323   : > { %v1464_v37 = vpop.eup %1463 }
 0x324   : > { %1100 = vperm.xlu1 %1442, %v1464_v37  }
 0x327   : > { %v1466_v38 = vpop.eup %1465 }
 0x328   : > { %1105 = vperm.xlu0 %1441, %v1466_v38  }
 0x34b   : > { %v810_v44 = vpop.f32.mrb[4].mxu0 }
 0x34c   : > { %v1061_v45 = vadd.f32 %v1057_v41, %v810_v44  ;;  %v1345_v46 = vpop.f32.mrb[5].mxu0 }
 0x34e   : > { %1065 = vst.msk [vmem:[#allocation5] sm:$0xff] %vm312_vm0, %v1061_v45 }
 0x34f   : > { %v883_v50 = vpop.f32.mrb[4].mxu1 }
 0x350   : > { %v1062_v51 = vadd.f32 %v1058_v48, %v883_v50  ;;  %v1350_v52 = vpop.f32.mrb[5].mxu1 }
 0x352   : > { %1066 = vst.msk [vmem:[#allocation5 + $0x8] sm:$0xff] %vm312_vm0, %v1062_v51 }
 0x353   : > { %v956_v56 = vpop.f32.mrb[6].mxu0 }
 0x354   : > { %v1063_v57 = vadd.f32 %v1059_v53, %v956_v56  ;;  %v1355_v58 = vpop.f32.mrb[7].mxu0 }
 0x355   : > { %v1084_v1 = vld [vmem:[#allocation5] sm:$0xff] }
 0x356   : > { %1067 = vst.msk [vmem:[#allocation5 + $0x10] sm:$0xff] %vm312_vm0, %v1063_v57 }
 0x357   : > { %v1029_v60 = vpop.f32.mrb[6].mxu1 }
 0x358   : > { %v1064_v61 = vadd.f32 %v1060_v59, %v1029_v60  ;;  %v1360_v62 = vpop.f32.mrb[7].mxu1 }
 0x359   : > { %v1085_v3 = vld [vmem:[#allocation5 + $0x8] sm:$0xff] }
 0x35a   : > { %1068 = vst.msk [vmem:[#allocation5 + $0x18] sm:$0xff] %vm312_vm0, %v1064_v61 }
 0x35d   : > { %v1086_v7 = vld [vmem:[#allocation5 + $0x10] sm:$0xff] }
 0x361   : > { %v1087_v0 = vld [vmem:[#allocation5 + $0x18] sm:$0xff] }
 0x39b   : > { %v1091_v63 = vpop.permute.xlu1 %1090 }
 0x39c   : > { %v1108_v2 = vmul.f32 %v1091_v63, %v1084_v1 }
 0x39e   : > { %1112 = vst.msk [vmem:[%s295_s24] sm:$0xff] %vm312_vm0, %v1108_v2 }
 0x39f   : > { %v1096_v4 = vpop.permute.xlu0 %1095 }
 0x3a0   : > { %v1109_v5 = vmul.f32 %v1096_v4, %v1085_v3 }
 0x3a2   : > { %1113 = vst.msk [vmem:[%s295_s24 + $0x8] sm:$0xff] %vm312_vm0, %v1109_v5 }
 0x3a3   : > { %v1101_v6 = vpop.permute.xlu1 %1100 }
 0x3a4   : > { %v1110_v8 = vmul.f32 %v1101_v6, %v1086_v7 }
 0x3a6   : > { %1114 = vst.msk [vmem:[%s295_s24 + $0x10] sm:$0xff] %vm312_vm0, %v1110_v8 }
 0x3a7   : > { %v1106_v9 = vpop.permute.xlu0 %1105 }
 0x3a8   : > { %v1111_v10 = vmul.f32 %v1106_v9, %v1087_v0 }
 0x3aa   : > { %1115 = vst.msk [vmem:[%s295_s24 + $0x18] sm:$0xff] %vm312_vm0, %v1111_v10 }
 0x3ab   : > { %1570 = shalt.err (!%p1567_p13)
}
 0x3ac   : > { %s1571_s28 = scalar_lea.hbm %s2031_s30, 512  ;;  %s1575_s10 = scalar_lea.hbm %s2084_s3, 1024 }
 0x3ad   : > { %p1572_p11 = scmp.ne.s32.totalorder %s2031_s30, %s1571_s28  ;;  %p1576_p7 = scmp.lt.u32.totalorder %s2031_s30, %s2084_s3 }
 0x3ae   : > { %p1577_p4 = scmp.lt.u32.totalorder %s1575_s10, %s1571_s28  ;;  %p1579_p0 = scmp.lt.u32.totalorder %s1571_s28, %s2031_s30 }
 0x3af   : > { %p1573_p2 = pnand %p1572_p11, %p2113_p10 }
 0x3b0   : > { %p1578_p3 = por %p1577_p4, %p1576_p7 }
 0x3b1   : > { %p1574_p5 = pneg %p1573_p2 }
 0x3b2   : > { %p1580_p8 = por %p1579_p0, %p1578_p3 }
 0x3b4   : > { %p1581_p9 = pnand %p1580_p8, %p1574_p5 }
 0x3b6   : > { %1584 = shalt.err (!%p1581_p9)
}
 0x3b7   : > { %s1655_s11 = smov 128   ;;  %s1656_s19 = smov 8  }
 0x3b8   : > { %1367 = dma.vmem_to_hbm [thread:$0]  (%p2113_p10), %s2025_s16, 512, %s2031_s30, %s1117_s6, %s1655_s11, %s1655_s11, %s1656_s19  }
 0x3b9 PF: > { %s1146_s9 = sand.u32 1, %s1623_s12   ;;  %p2114_p12 = scmp.ne.s32.totalorder %s2101_s27, 0 }
 0x3ba   : > { %p2115_p1 = scmp.ge.s32.totalorder %s1643_s17, 2  ;;  %s1147_s18 = scalar_lea.sflag [#allocation8], %s1146_s9 }
 0x3bc   : > { %p1380_p6 = pnand %p2115_p1, %p2114_p12 }
 0x3be   : > { %1618 = dma.done.wait (!%p1380_p6), %s1147_s18, 512  }
 0x3bf   : > { %1620 = vsyncadd (!%p1380_p6), %s1147_s18, 4294966784  ;;  %s22_s17 = sadd.s32 1, %s1643_s17   ;;  %s2116_s24 = sld [smem:[#allocation18_spill]] }
 0x3c0   : > { %p19_p13 = scmp.ge.s32.totalorder %s22_s17, 4   ;;  %s2117_s15 = sld [smem:[#allocation16_spill]] }
 0x3c1   : > { %s2118_s16 = sld [smem:[#allocation17_spill]]  ;;  %s2119_s12 = smov %s1627_s13 }
 0x3c2   : > { %s2120_s13 = smov %s1631_s14  ;;  %21 = sbr.rel (!%p19_p13) target bundleno = 10 (0xa), region = 109 }
 0x3c5   : > { %s2121_s14 = smov %s2116_s24 }
 0x3c9   :  { %1152 = vsyncpa [#allocation7], 1 }
 0x3ca   :  { %1154 = vsyncpa [#allocation7 + $0x1], 1 }
 0x3cb   :  { %1155 = vsyncpa [#allocation10], 1 }
 0x3cc   :  { %1157 = vsyncpa [#allocation10 + $0x1], 1 }
 0x3cd   :  { %1158 = vsyncpa [#allocation8], 1 }
 0x3ce   :  { %1160 = vsyncpa [#allocation8 + $0x1], 1 }

</bundles_post_ra>
